<compile_context>
chip_gen: v5e
topology: v5e:2x2
jax: 0.10.0
libtpu: 0.0.40
codegen_flags: <defaults>
</compile_context>

<pallas_src>
import functools

import jax
import jax.numpy as jnp
from jax import lax
from jax.experimental import pallas as pl
from jax.experimental.pallas import tpu as pltpu

LANES = 128
SUBLANES = 8
DEFAULT_ROW_TILE = 4096      # 4096 x 128 f32 = 2 MiB per input block
CHUNK_ROWS = 512             # rows per streamed compute chunk inside a block
VMEM_LIMIT_BYTES = 40 * 1024 * 1024


def _num_shards_for_device():
    """2 on v7x (two TensorCores per chip), 1 on single-core v5e/v6e."""
    try:
        kind = jax.devices()[0].device_kind.lower()
    except Exception:
        return 1
    return 2 if "v7" in kind else 1


def _asym_mse_kernel(pred_ref, targ_ref, o_ref, *, low_thr, high_thr, w_low,
                     w_high, row_tile, chunk_rows, rows_total, tiles_per_shard,
                     num_full_tiles, any_masked):
    c = pl.program_id(0)   # shard axis (one per TensorCore on v7x)
    i = pl.program_id(1)   # reduction axis ("arbitrary", last)

    # o_ref's block index depends only on c, so it stays VMEM-resident across
    # the whole reduction axis; zero it on the first step of each shard.
    @pl.when(i == 0)
    def _():
        o_ref[...] = jnp.zeros_like(o_ref)

    num_chunks = row_tile // chunk_rows

    def weighted_sq(p, t):
        p = p.astype(jnp.float32)
        t = t.astype(jnp.float32)
        # High threshold checked first == PyTorch's "assigned last overrides low".
        w = jnp.where(t >= high_thr, jnp.float32(w_high),
                      jnp.where(t < low_thr, jnp.float32(w_low), jnp.float32(1.0)))
        d = p - t
        return w * d * d

    def fold(x):
        # Fold sublane groups with pure VALU adds; stay lane-dense (8, 128).
        return x.reshape(chunk_rows // SUBLANES, SUBLANES, LANES).sum(axis=0)

    def accumulate_unmasked():
        def body(k, acc):
            r0 = pl.multiple_of(k * chunk_rows, chunk_rows)
            contrib = weighted_sq(pred_ref[pl.ds(r0, chunk_rows), :],
                                  targ_ref[pl.ds(r0, chunk_rows), :])
            return acc + fold(contrib)

        acc = lax.fori_loop(0, num_chunks, body,
                            jnp.zeros((SUBLANES, LANES), jnp.float32),
                            unroll=True)
        o_ref[...] += acc

    if not any_masked:
        accumulate_unmasked()
    else:
        logical_tile = c * tiles_per_shard + i

        # Full tiles skip the mask entirely (keeps v7x HBM-bound, not VALU-bound).
        @pl.when(logical_tile < num_full_tiles)
        def _():
            accumulate_unmasked()

        @pl.when(logical_tile >= num_full_tiles)
        def _():
            # Valid rows left in this logical tile. <= 0 for clamped duplicate
            # tiles on a short shard, which therefore contribute exactly zero.
            limit = rows_total - logical_tile * row_tile
            row_ids = lax.broadcasted_iota(jnp.int32, (chunk_rows, LANES), 0)

            def body(k, acc):
                r0 = pl.multiple_of(k * chunk_rows, chunk_rows)
                contrib = weighted_sq(pred_ref[pl.ds(r0, chunk_rows), :],
                                      targ_ref[pl.ds(r0, chunk_rows), :])
                # Chunk-local iota vs. precomputed scalar limit (no per-element
                # global row-index add).
                contrib = jnp.where(row_ids < (limit - r0), contrib, 0.0)
                return acc + fold(contrib)

            acc = lax.fori_loop(0, num_chunks, body,
                                jnp.zeros((SUBLANES, LANES), jnp.float32),
                                unroll=True)
            o_ref[...] += acc


def _weighted_sq_sum(pred, target, low_thr, high_thr, w_low, w_high):
    """Plain-XLA weighted squared-error sum (tiny or ragged-size inputs)."""
    p = pred.astype(jnp.float32)
    t = target.astype(jnp.float32)
    w = jnp.where(t >= high_thr, jnp.float32(w_high),
                  jnp.where(t < low_thr, jnp.float32(w_low), jnp.float32(1.0)))
    return jnp.sum(w * (p - t) ** 2)


def asym_weighted_mse(pred, target, low_thr, high_thr, w_low=0.2, w_high=2.0, *,
                      row_tile=DEFAULT_ROW_TILE, num_shards=None):
    """Asymmetric weighted MSE over all elements of pred/target (same shape)."""
    assert pred.shape == target.shape
    n_true = int(pred.size)
    low_thr, high_thr = float(low_thr), float(high_thr)
    w_low, w_high = float(w_low), float(w_high)

    pred_flat = jnp.ravel(pred)      # bitcast, no copy
    targ_flat = jnp.ravel(target)

    # Sublane packing of the *input* dtype (8 f32, 16 bf16, 32 int8/fp8): block
    # row counts must be multiples of this for legal tiling.
    itemsize = max(1, jnp.dtype(pred.dtype).itemsize)
    sub = SUBLANES * max(1, 4 // itemsize)

    rows, rem = divmod(n_true, LANES)

    if rem != 0 or rows < sub:
        # Ragged (size not a multiple of 128) or tiny inputs: one fused XLA
        # reduction reads the data exactly once, which is cheaper than paying a
        # near-full-size slice copy just to feed the tiled kernel.
        s = _weighted_sq_sum(pred_flat, targ_flat, low_thr, high_thr, w_low, w_high)
        return s / jnp.float32(n_true)

    pred2 = pred_flat.reshape(rows, LANES)   # bitcast, no copy
    targ2 = targ_flat.reshape(rows, LANES)

    if num_shards is None:
        num_shards = _num_shards_for_device()

    # Block row count: multiple of the dtype's sublane packing, capped at the
    # array's row count.
    row_tile_eff = min(int(row_tile), (rows // sub) * sub)
    row_tile_eff = max(sub, (row_tile_eff // sub) * sub)

    chunk_rows = CHUNK_ROWS if row_tile_eff % CHUNK_ROWS == 0 else row_tile_eff

    num_tiles = -(-rows // row_tile_eff)
    tiles_per_shard = -(-num_tiles // num_shards)
    num_full_tiles = rows // row_tile_eff
    any_masked = (rows % row_tile_eff != 0) or (num_tiles != tiles_per_shard * num_shards)

    if num_shards == 1:
        def in_index_map(c, i):
            return (i, 0)
    else:
        def in_index_map(c, i):
            # Clamp so a short shard re-reads a valid block; its contribution
            # is zeroed by the in-kernel row mask.
            return (jnp.minimum(c * tiles_per_shard + i, num_tiles - 1), 0)

    if num_shards > 1:
        # Make the 2-TensorCore split real on v7x.
        shard_sem = getattr(pltpu, "CORE_PARALLEL", "parallel")
        dim_sem = (shard_sem, "arbitrary")
    else:
        dim_sem = ("arbitrary", "arbitrary")

    kernel = functools.partial(
        _asym_mse_kernel,
        low_thr=low_thr, high_thr=high_thr, w_low=w_low, w_high=w_high,
        row_tile=row_tile_eff, chunk_rows=chunk_rows, rows_total=rows,
        tiles_per_shard=tiles_per_shard, num_full_tiles=num_full_tiles,
        any_masked=any_masked)

    partials = pl.pallas_call(
        kernel,
        out_shape=jax.ShapeDtypeStruct((num_shards, SUBLANES, LANES), jnp.float32),
        grid_spec=pltpu.PrefetchScalarGridSpec(
            num_scalar_prefetch=0,
            grid=(num_shards, tiles_per_shard),
            in_specs=[
                pl.BlockSpec((row_tile_eff, LANES), in_index_map),
                pl.BlockSpec((row_tile_eff, LANES), in_index_map),
            ],
            out_specs=pl.BlockSpec((None, SUBLANES, LANES), lambda c, i: (c, 0, 0)),
        ),
        compiler_params=pltpu.CompilerParams(
            dimension_semantics=dim_sem,
            vmem_limit_bytes=VMEM_LIMIT_BYTES),
    )(pred2, targ2)

    # NOTE: one f32 accumulator per shard; fine for a training loss but may
    # drift slightly vs. a pairwise-summed reference for N >~ 1e9 elements.
    return jnp.sum(partials) / jnp.float32(n_true)


def _reference(pred, target, low_thr, high_thr, w_low, w_high):
    w = jnp.ones_like(target)
    w = jnp.where(target < low_thr, w_low, w)
    w = jnp.where(target >= high_thr, w_high, w)  # applied last -> overrides
    return jnp.mean(w * (pred - target) ** 2)


if __name__ == "__main__":
    key = jax.random.PRNGKey(0)
    k1, k2, k3, k4 = jax.random.split(key, 4)

    low_thr, high_thr = -0.5, 0.5
    w_low, w_high = 0.2, 2.0

    # Case 1: small NCHW input whose element count is a multiple of 128
    # (the main, fully unmasked kernel path).
    B, C, H, W = 2, 4, 16, 16
    pred = jax.random.normal(k1, (B, C, H, W), dtype=jnp.float32)
    target = jax.random.normal(k2, (B, C, H, W), dtype=jnp.float32)
    loss = asym_weighted_mse(pred, target, low_thr, high_thr, w_low, w_high)
    loss = jax.block_until_ready(loss)
    ref = _reference(pred, target, low_thr, high_thr, w_low, w_high)
    assert jnp.allclose(loss, ref, rtol=1e-5, atol=1e-6), (loss, ref)

    # Case 2: multiple of 128 but with a ragged last row tile (masked branch).
    pred2 = jax.random.normal(k3, (2, 4, 16, 20), dtype=jnp.float32)
    target2 = jax.random.normal(k4, (2, 4, 16, 20), dtype=jnp.float32)
    loss2 = asym_weighted_mse(pred2, target2, low_thr, high_thr, w_low, w_high)
    loss2 = jax.block_until_ready(loss2)
    ref2 = _reference(pred2, target2, low_thr, high_thr, w_low, w_high)
    assert jnp.allclose(loss2, ref2, rtol=1e-5, atol=1e-6), (loss2, ref2)

    print("KERNEL_OK")
</pallas_src>

<mosaic_0001>
module attributes {stable_mosaic.version = 11 : i64} {
  func.func @_asym_mse_kernel(%arg0: i32, %arg1: i32, %arg2: memref<16x128xf32, #tpu.memory_space<vmem>>, %arg3: memref<16x128xf32, #tpu.memory_space<vmem>>, %arg4: memref<1x8x128xf32, #tpu.memory_space<vmem>>) attributes {dimension_semantics = [#tpu.dimension_semantics<arbitrary>, #tpu.dimension_semantics<arbitrary>], iteration_bounds = array<i64: 1, 1>, scalar_prefetch = 0 : i64, scratch_operands = 0 : i64, tpu.core_type = #tpu.core_type<tc>, window_params = [{transform_indices = @transform_0, window_bounds = array<i64: 16, 128>}, {transform_indices = @transform_1, window_bounds = array<i64: 16, 128>}, {transform_indices = @transform_2, window_bounds = array<i64: 1, 8, 128>}]} {
    %c0_i32 = arith.constant 0 : i32
    %0 = arith.cmpi eq, %arg1, %c0_i32 : i32
    %1 = arith.extui %0 : i1 to i32
    %c0_i32_0 = arith.constant 0 : i32
    %2 = arith.cmpi ne, %1, %c0_i32_0 : i32
    scf.if %2 {
      %cst_15 = arith.constant 0.000000e+00 : f32
      %31 = vector.broadcast %cst_15 : f32 to vector<8x128xf32>
      %c0_16 = arith.constant 0 : index
      %c0_17 = arith.constant 0 : index
      %c0_18 = arith.constant 0 : index
      %32 = vector.load %arg4[%c0_16, %c0_17, %c0_18] : memref<1x8x128xf32, #tpu.memory_space<vmem>>, vector<1x8x128xf32>
      %33 = vector.shape_cast %32 : vector<1x8x128xf32> to vector<8x128xf32>
      %34 = vector.shape_cast %31 : vector<8x128xf32> to vector<1x8x128xf32>
      tpu.vector_store %arg4[%c0_16, %c0_17, %c0_18], %34 {strides = array<i32>} : memref<1x8x128xf32, #tpu.memory_space<vmem>>, vector<1x8x128xf32>,
    } else {
    }
    %cst = arith.constant 0.000000e+00 : f32
    %3 = vector.broadcast %cst : f32 to vector<8x128xf32>
    %c0_i32_1 = arith.constant 0 : i32
    %c16_i32 = arith.constant 16 : i32
    %4 = arith.muli %c0_i32_1, %c16_i32 : i32
    %5 = tpu.assume_multiple %4, 16 : i32
    %6 = arith.index_cast %5 : i32 to index
    %c0 = arith.constant 0 : index
    %7 = vector.load %arg2[%6, %c0] : memref<16x128xf32, #tpu.memory_space<vmem>>, vector<16x128xf32>
    %8 = arith.index_cast %5 : i32 to index
    %c0_2 = arith.constant 0 : index
    %9 = vector.load %arg3[%8, %c0_2] : memref<16x128xf32, #tpu.memory_space<vmem>>, vector<16x128xf32>
    %cst_3 = arith.constant 5.000000e-01 : f32
    %10 = vector.broadcast %cst_3 : f32 to vector<16x128xf32>
    %11 = arith.cmpf oge, %9, %10 : vector<16x128xf32>
    %cst_4 = arith.constant -5.000000e-01 : f32
    %12 = vector.broadcast %cst_4 : f32 to vector<16x128xf32>
    %13 = arith.cmpf olt, %9, %12 : vector<16x128xf32>
    %cst_5 = arith.constant 2.000000e-01 : f32
    %cst_6 = arith.constant 1.000000e+00 : f32
    %14 = vector.broadcast %cst_5 : f32 to vector<16x128xf32>
    %15 = vector.broadcast %cst_6 : f32 to vector<16x128xf32>
    %16 = arith.select %13, %14, %15 : vector<16x128xi1>, vector<16x128xf32>
    %cst_7 = arith.constant 2.000000e+00 : f32
    %17 = vector.broadcast %cst_7 : f32 to vector<16x128xf32>
    %18 = arith.select %11, %17, %16 : vector<16x128xi1>, vector<16x128xf32>
    %19 = arith.subf %7, %9 : vector<16x128xf32>
    %20 = arith.mulf %18, %19 : vector<16x128xf32>
    %21 = arith.mulf %20, %19 : vector<16x128xf32>
    %22 = vector.shape_cast %21 : vector<16x128xf32> to vector<2x8x128xf32>
    %cst_8 = arith.constant dense<0.000000e+00> : vector<8x128xf32>
    %23 = vector.multi_reduction <add>, %22, %cst_8 [0] : vector<2x8x128xf32> to vector<8x128xf32>
    %24 = arith.addf %3, %23 : vector<8x128xf32>
    %c1_i32 = arith.constant 1 : i32
    %c0_9 = arith.constant 0 : index
    %c0_10 = arith.constant 0 : index
    %c0_11 = arith.constant 0 : index
    %25 = vector.load %arg4[%c0_9, %c0_10, %c0_11] : memref<1x8x128xf32, #tpu.memory_space<vmem>>, vector<1x8x128xf32>
    %26 = vector.shape_cast %25 : vector<1x8x128xf32> to vector<8x128xf32>
    %27 = arith.addf %26, %24 : vector<8x128xf32>
    %c0_12 = arith.constant 0 : index
    %c0_13 = arith.constant 0 : index
    %c0_14 = arith.constant 0 : index
    %28 = vector.load %arg4[%c0_12, %c0_13, %c0_14] : memref<1x8x128xf32, #tpu.memory_space<vmem>>, vector<1x8x128xf32>
    %29 = vector.shape_cast %28 : vector<1x8x128xf32> to vector<8x128xf32>
    %30 = vector.shape_cast %27 : vector<8x128xf32> to vector<1x8x128xf32>
    tpu.vector_store %arg4[%c0_12, %c0_13, %c0_14], %30 {strides = array<i32>} : memref<1x8x128xf32, #tpu.memory_space<vmem>>, vector<1x8x128xf32>,
    return
  }
  func.func @transform_0(%arg0: i32, %arg1: i32) -> (i32, i32) {
    %c0_i32 = arith.constant 0 : i32
    %c0_i32_0 = arith.constant 0 : i32
    return %arg1, %c0_i32 : i32, i32
  }
  func.func @transform_1(%arg0: i32, %arg1: i32) -> (i32, i32) {
    %c0_i32 = arith.constant 0 : i32
    %c0_i32_0 = arith.constant 0 : i32
    return %arg1, %c0_i32 : i32, i32
  }
  func.func @transform_2(%arg0: i32, %arg1: i32) -> (i32, i32, i32) {
    %c0_i32 = arith.constant 0 : i32
    %c0_i32_0 = arith.constant 0 : i32
    %c0_i32_1 = arith.constant 0 : i32
    return %arg0, %c0_i32, %c0_i32_0 : i32, i32, i32
  }
}

</mosaic_0001>

<bundles_post_ra>
// kernel: tpu_custom_call.1
= control target key start
LH: loop header
LB: loop body
LE: loop exit
PB: predicated region body
PF: predicated region fallthrough
CT: control target
= control target key end

     0   :  { %7 = vsyncpa [#allocation3], 0  ;;  %s205_s0 = inlined_call_operand.hbm [shape: f32[16,128], index: 0, kind: input, shape index: {}]   ;;  %s206_s1 = inlined_call_operand.hbm [shape: f32[16,128], index: 1, kind: input, shape index: {}]   ;;  %s207_s2 = inlined_call_operand.hbm [shape: f32[1,8,128], index: 2, kind: output, shape index: {}]  }
   0x1   :  { %8 = vsyncpa [#allocation6], 0 }
   0x2   :  { %9 = vsyncpa [#allocation4], 0  ;;  %s14_s11 = sshll.u32 %s205_s0, 4  ;;  %s175_s12 = smov [#allocation2]   ;;  %s15_s11 = int_to_ptr.hbm [resolvable:$true] %s14_s11 }
   0x3   :  { %s16_s13 = sshll.u32 %s175_s12, 4  ;;  %s27_s16 = sshll.u32 %s206_s1, 4  ;;  %s17_s13 = int_to_ptr.vmem [resolvable:$true] %s16_s13  ;;  %s28_s16 = int_to_ptr.hbm [resolvable:$true] %s27_s16 }
   0x4   :  { %s176_s17 = smov 128   ;;  %s177_s18 = smov 8  }
   0x5   :  { %22 = dma.hbm_to_vmem [thread:$0]  %s15_s11, 256, %s17_s13, [#allocation3], %s176_s17, %s176_s17, %s177_s18  }
   0x6   :  { %s178_s19 = smov [#allocation5]  }
   0x7   :  { %s29_s20 = sshll.u32 %s178_s19, 4  ;;  %s30_s20 = int_to_ptr.vmem [resolvable:$true] %s29_s20 }
   0x8   :  { %35 = dma.hbm_to_vmem [thread:$0]  %s28_s16, 256, %s30_s20, [#allocation6], %s176_s17, %s176_s17, %s177_s18  }
   0x9   :  { %169 = dma.done.wait [#allocation3], 256  }
   0xa   :  { %170 = vsyncadd [#allocation3], 4294967040 }
   0xb   :  { %171 = dma.done.wait [#allocation6], 256  }
   0xc   :  { %172 = vsyncadd [#allocation6], 4294967040  ;;  %v49_v0 = vld [vmem:[#allocation2] sm:$0xff]  ;;  %v50_v1 = vld [vmem:[#allocation2 + $0x8] sm:$0xff]  ;;  %v179_v5 = vmov 1.0   ;;  %s180_s0 = smov [#allocation7]  }
   0xd   :  { %v51_v2 = vld [vmem:[#allocation5] sm:$0xff]  ;;  %v52_v3 = vld [vmem:[#allocation5 + $0x8] sm:$0xff]  ;;  %s77_s1 = sshll.u32 %s180_s0, 4  ;;  %s79_s23 = sshll.u32 %s207_s2, 4  ;;  %s78_s1 = int_to_ptr.vmem [resolvable:$true] %s77_s1  ;;  %s80_s23 = int_to_ptr.hbm [resolvable:$true] %s79_s23 }
   0xe   :  { %vm53_vm0 = vcmp.ge.f32.partialorder %v51_v2, 0.5  ;;  %vm55_vm1 = vcmp.lt.f32.partialorder %v51_v2, -0.5  ;;  %v61_v4 = vsub.f32 %v49_v0, %v51_v2  ;;  %vm54_vm2 = vcmp.ge.f32.partialorder %v52_v3, 0.5 }
   0xf   :  { %vm56_vm3 = vcmp.lt.f32.partialorder %v52_v3, -0.5  ;;  %v57_v6 = vsel %vm55_vm1, 0.2, %v179_v5  ;;  %v62_v7 = vsub.f32 %v50_v1, %v52_v3 }
  0x10   :  { %v58_v8 = vsel %vm56_vm3, 0.2, %v179_v5  ;;  %v59_v9 = vsel %vm53_vm0, 2.0, %v57_v6 }
  0x11   :  { %v60_v10 = vsel %vm54_vm2, 2.0, %v58_v8  ;;  %v63_v11 = vmul.f32 %v61_v4, %v59_v9 }
  0x12   :  { %v64_v12 = vmul.f32 %v62_v7, %v60_v10 }
  0x13   :  { %v65_v13 = vmul.f32 %v63_v11, %v61_v4 }
  0x14   :  { %v66_v14 = vmul.f32 %v64_v12, %v62_v7 }
  0x16   :  { %v67_v15 = vadd.f32 %v66_v14, %v65_v13 }
  0x18   :  { %71 = vst [vmem:[#allocation7] sm:$0xff] %v67_v15 }
  0x19   :  { %82 = dma.vmem_to_hbm [thread:$0]  %s78_s1, 128, %s80_s23, [#allocation4]  }
  0x1a   :  { %173 = dma.done.wait [#allocation4], 128  }
  0x1b   :  { %174 = vsyncadd [#allocation4], 4294967168 }
  0x1c   :  { %87 = vsyncpa [#allocation3], 1 }
  0x1d   :  { %88 = vsyncpa [#allocation6], 1 }
  0x1e   :  { %89 = vsyncpa [#allocation4], 1 }

</bundles_post_ra>
